<compile_context>
chip_gen: v5e
topology: v5e:2x2
jax: 0.10.0
libtpu: 0.0.40
codegen_flags: <defaults>
</compile_context>

<pallas_src>
from typing import NamedTuple

import jax
import jax.numpy as jnp
from jax.experimental import pallas as pl
from jax.experimental.pallas import tpu as pltpu


def _round_up(n, m):
    return ((n + m - 1) // m) * m


def _cdiv(a, b):
    return (a + b - 1) // b


def _pad2d(a, rows, cols):
    r, c = a.shape
    return jnp.pad(a, ((0, rows - r), (0, cols - c)))


class PreparedParams(NamedTuple):
    w1: jax.Array          # (IN,  HIDP) bf16
    b1: jax.Array          # (1,   HIDP) bf16
    w2: jax.Array          # (HIDP, NCP) bf16
    b2: jax.Array          # (1,    NCP) f32
    input_size: int
    num_classes: int


def _make_mlp_kernel(elementwise_bf16):
    def mlp_kernel(x_ref, w1_ref, b1_ref, w2_ref, b2_ref, o_ref):
        # x_ref:  (bt, IN)   f32     w1_ref: (IN, HIDP)  bf16   b1_ref: (1, HIDP) bf16
        # w2_ref: (HIDP,NCP) bf16    b2_ref: (1, NCP)    f32    o_ref:  (bt, NCP) f32
        x = x_ref[...].astype(jnp.bfloat16)                      # in-kernel cast (VPU)
        h = jnp.dot(x, w1_ref[...], preferred_element_type=jnp.float32)
        if elementwise_bf16:
            # v6e/v7x: bias + ReLU in bf16 (half the vregs per pass, no extra cast
            # pass); feeds the second MXU matmul directly.
            h = jnp.maximum(h.astype(jnp.bfloat16) + b1_ref[...], 0)
        else:
            # v5e: no bf16 VPU -> keep elementwise math in f32.
            h = jnp.maximum(h + b1_ref[...].astype(jnp.float32), 0.0)
            h = h.astype(jnp.bfloat16)
        out = jnp.dot(h, w2_ref[...], preferred_element_type=jnp.float32) + b2_ref[...]
        o_ref[...] = out.astype(o_ref.dtype)

    return mlp_kernel


def prepare_params(w1, b1, w2, b2):
    """One-time pad/cast of the parameters (call once at init, reuse per forward).

    Weights are in [in_features, out_features] layout (transpose of nn.Linear's
    [out, in]).  The contraction dim of W1 stays unpadded (= input_size); the
    hidden and class dims are padded to lane multiples of 128.
    """
    b1 = jnp.reshape(b1, (1, -1))
    b2 = jnp.reshape(b2, (1, -1))
    IN, HID = w1.shape
    HID2, NC = w2.shape
    assert HID2 == HID and b1.shape[1] == HID and b2.shape[1] == NC
    HIDP = _round_up(max(HID, 128), 128)
    NCP = _round_up(max(NC, 128), 128)
    w1p = _pad2d(w1, IN, HIDP).astype(jnp.bfloat16)
    b1p = _pad2d(b1, 1, HIDP).astype(jnp.bfloat16)
    w2p = _pad2d(w2, HIDP, NCP).astype(jnp.bfloat16)
    b2p = _pad2d(b2, 1, NCP).astype(jnp.float32)
    return PreparedParams(w1p, b1p, w2p, b2p, int(IN), int(NC))


def neural_net_forward(x, params, *, elementwise_bf16=True,
                       max_batch_tile=512, min_grid_steps=4):
    """Fused Linear->ReLU->Linear.  x: (B, IN) f32; returns (B, num_classes) f32."""
    B, IN = x.shape
    assert IN == params.input_size
    HIDP = params.w1.shape[1]
    NCP = params.w2.shape[1]

    # Adaptive batch tile: aim for >= min_grid_steps grid steps (pipelining +
    # both v7x TCs busy), sublane-aligned, capped for VMEM / streaming efficiency.
    bt = _round_up(max(1, _cdiv(B, min_grid_steps)), 16)
    bt = max(16, min(bt, max_batch_tile))
    BP = _round_up(B, bt)
    xp = x if BP == B else jnp.pad(x, ((0, BP - B), (0, 0)))  # only when needed

    out = pl.pallas_call(
        _make_mlp_kernel(elementwise_bf16),
        out_shape=jax.ShapeDtypeStruct((BP, NCP), jnp.float32),
        grid_spec=pltpu.PrefetchScalarGridSpec(
            num_scalar_prefetch=0,
            grid=(BP // bt,),
            in_specs=[
                pl.BlockSpec((bt, IN), lambda i: (i, 0)),     # x tile (f32, unpadded K)
                pl.BlockSpec((IN, HIDP), lambda i: (0, 0)),   # W1 (VMEM-resident)
                pl.BlockSpec((1, HIDP), lambda i: (0, 0)),    # b1 (VMEM-resident)
                pl.BlockSpec((HIDP, NCP), lambda i: (0, 0)),  # W2 (VMEM-resident)
                pl.BlockSpec((1, NCP), lambda i: (0, 0)),     # b2 (VMEM-resident)
            ],
            out_specs=pl.BlockSpec((bt, NCP), lambda i: (i, 0)),
        ),
        compiler_params=pltpu.CompilerParams(
            dimension_semantics=("parallel",)),
    )(xp, params.w1, params.b1, params.w2, params.b2)
    return out[:B, :params.num_classes]


def init_params(key, input_size, hidden_size, num_classes, dtype=jnp.float32):
    # Deterministic init mimicking nn.Linear's U(-1/sqrt(fan_in), 1/sqrt(fan_in)).
    k1, k2, k3, k4 = jax.random.split(key, 4)
    bound1 = 1.0 / jnp.sqrt(input_size)
    bound2 = 1.0 / jnp.sqrt(hidden_size)
    w1 = jax.random.uniform(k1, (input_size, hidden_size), dtype, -bound1, bound1)
    b1 = jax.random.uniform(k2, (1, hidden_size), dtype, -bound1, bound1)
    w2 = jax.random.uniform(k3, (hidden_size, num_classes), dtype, -bound2, bound2)
    b2 = jax.random.uniform(k4, (1, num_classes), dtype, -bound2, bound2)
    return w1, b1, w2, b2


def reference_forward_f32(x, w1, b1, w2, b2):
    h = jnp.maximum(jnp.dot(x, w1) + b1, 0.0)
    return jnp.dot(h, w2) + b2


def reference_forward_quantized(x, w1, b1, w2, b2):
    # Mirrors the kernel's default (elementwise_bf16=True) quantization exactly.
    h = jnp.dot(x.astype(jnp.bfloat16), w1.astype(jnp.bfloat16),
                preferred_element_type=jnp.float32)
    h = jnp.maximum(h.astype(jnp.bfloat16) + b1.astype(jnp.bfloat16), 0)
    return jnp.dot(h, w2.astype(jnp.bfloat16),
                   preferred_element_type=jnp.float32) + b2


if __name__ == "__main__":
    # Shapes consistent with the module:
    #   input_size  = X_train.shape[1]   -> 34 (17 pose keypoints x 2)
    #   hidden_size = 2048 in the script -> 256 small stand-in
    #   num_classes = len(class_weights) -> 8
    B, IN, HID, NC = 512, 34, 256, 8

    key = jax.random.PRNGKey(0)
    kx, kp = jax.random.split(key)
    x = jax.random.uniform(kx, (B, IN), jnp.float32)      # MinMax-scaled features
    w1, b1, w2, b2 = init_params(kp, IN, HID, NC)
    params = prepare_params(w1, b1, w2, b2)                # one-time pad/cast

    ref_q = reference_forward_quantized(x, w1, b1, w2, b2)
    ref_f = reference_forward_f32(x, w1, b1, w2, b2)

    # Default (v6e/v7x) path: bf16 bias+ReLU; B=512 -> bt=128 -> grid=(4,).
    out = jax.block_until_ready(neural_net_forward(x, params))
    assert out.shape == (B, NC)
    assert jnp.allclose(out, ref_q, atol=1e-3, rtol=1e-3)        # same-quantization ref
    assert jnp.allclose(out, ref_f, atol=5e-2, rtol=5e-2)        # bounds bf16 quant error

    # v5e path: f32 elementwise math.
    out_f32ew = jax.block_until_ready(
        neural_net_forward(x, params, elementwise_bf16=False))
    assert out_f32ew.shape == (B, NC)
    assert jnp.allclose(out_f32ew, ref_f, atol=5e-2, rtol=5e-2)

    # Ragged batch: exercises adaptive tile + batch padding (B=100 -> bt=32).
    B2 = 100
    out2 = jax.block_until_ready(neural_net_forward(x[:B2], params))
    assert out2.shape == (B2, NC)
    assert jnp.allclose(out2, ref_q[:B2], atol=1e-3, rtol=1e-3)

    print("KERNEL_OK")
</pallas_src>

<mosaic_0001>
module attributes {stable_mosaic.version = 11 : i64} {
  func.func @mlp_kernel(%arg0: i32, %arg1: memref<128x34xf32, #tpu.memory_space<vmem>>, %arg2: memref<34x256xbf16, #tpu.memory_space<vmem>>, %arg3: memref<1x256xbf16, #tpu.memory_space<vmem>>, %arg4: memref<256x128xbf16, #tpu.memory_space<vmem>>, %arg5: memref<1x128xf32, #tpu.memory_space<vmem>>, %arg6: memref<128x128xf32, #tpu.memory_space<vmem>>) attributes {dimension_semantics = [#tpu.dimension_semantics<parallel>], iteration_bounds = array<i64: 4>, scalar_prefetch = 0 : i64, scratch_operands = 0 : i64, tpu.core_type = #tpu.core_type<tc>, window_params = [{transform_indices = @transform_0, window_bounds = array<i64: 128, 34>}, {pipeline_mode = #tpu.pipeline_mode<synchronous>, transform_indices = @transform_1, window_bounds = array<i64: 34, 256>}, {pipeline_mode = #tpu.pipeline_mode<synchronous>, transform_indices = @transform_2, window_bounds = array<i64: 1, 256>}, {pipeline_mode = #tpu.pipeline_mode<synchronous>, transform_indices = @transform_3, window_bounds = array<i64: 256, 128>}, {pipeline_mode = #tpu.pipeline_mode<synchronous>, transform_indices = @transform_4, window_bounds = array<i64: 1, 128>}, {transform_indices = @transform_5, window_bounds = array<i64: 128, 128>}]} {
    %c0 = arith.constant 0 : index
    %c0_0 = arith.constant 0 : index
    %0 = vector.load %arg1[%c0, %c0_0] : memref<128x34xf32, #tpu.memory_space<vmem>>, vector<128x34xf32>
    %1 = arith.truncf %0 : vector<128x34xf32> to vector<128x34xbf16>
    %c0_1 = arith.constant 0 : index
    %c0_2 = arith.constant 0 : index
    %2 = vector.load %arg2[%c0_1, %c0_2] : memref<34x256xbf16, #tpu.memory_space<vmem>>, vector<34x256xbf16>
    %cst = arith.constant dense<0.000000e+00> : vector<128x256xf32>
    %3 = tpu.matmul %1, %2, %cst {dimension_numbers = #tpu.dot_dimension_numbers<[1], [0], [0], [1], [0, 0, 1, 1], [], []>} : vector<128x34xbf16>, vector<34x256xbf16>, vector<128x256xf32> -> vector<128x256xf32>
    %4 = arith.truncf %3 : vector<128x256xf32> to vector<128x256xbf16>
    %c0_3 = arith.constant 0 : index
    %c0_4 = arith.constant 0 : index
    %5 = vector.load %arg3[%c0_3, %c0_4] : memref<1x256xbf16, #tpu.memory_space<vmem>>, vector<1x256xbf16>
    %6 = vector.broadcast %5 : vector<1x256xbf16> to vector<128x256xbf16>
    %7 = arith.addf %4, %6 : vector<128x256xbf16>
    %cst_5 = arith.constant 0.000000e+00 : bf16
    %8 = vector.broadcast %cst_5 : bf16 to vector<128x256xbf16>
    %9 = arith.maximumf %7, %8 : vector<128x256xbf16>
    %c0_6 = arith.constant 0 : index
    %c0_7 = arith.constant 0 : index
    %10 = vector.load %arg4[%c0_6, %c0_7] : memref<256x128xbf16, #tpu.memory_space<vmem>>, vector<256x128xbf16>
    %cst_8 = arith.constant dense<0.000000e+00> : vector<128x128xf32>
    %11 = tpu.matmul %9, %10, %cst_8 {dimension_numbers = #tpu.dot_dimension_numbers<[1], [0], [0], [1], [0, 0, 1, 1], [], []>} : vector<128x256xbf16>, vector<256x128xbf16>, vector<128x128xf32> -> vector<128x128xf32>
    %c0_9 = arith.constant 0 : index
    %c0_10 = arith.constant 0 : index
    %12 = vector.load %arg5[%c0_9, %c0_10] : memref<1x128xf32, #tpu.memory_space<vmem>>, vector<1x128xf32>
    %13 = vector.broadcast %12 : vector<1x128xf32> to vector<128x128xf32>
    %14 = arith.addf %11, %13 : vector<128x128xf32>
    %c0_11 = arith.constant 0 : index
    %c0_12 = arith.constant 0 : index
    %15 = vector.load %arg6[%c0_11, %c0_12] : memref<128x128xf32, #tpu.memory_space<vmem>>, vector<128x128xf32>
    tpu.vector_store %arg6[%c0_11, %c0_12], %14 {strides = array<i32>} : memref<128x128xf32, #tpu.memory_space<vmem>>, vector<128x128xf32>,
    return
  }
  func.func @transform_0(%arg0: i32) -> (i32, i32) {
    %c0_i32 = arith.constant 0 : i32
    %c0_i32_0 = arith.constant 0 : i32
    return %arg0, %c0_i32 : i32, i32
  }
  func.func @transform_1(%arg0: i32) -> (i32, i32) {
    %c0_i32 = arith.constant 0 : i32
    %c0_i32_0 = arith.constant 0 : i32
    %c0_i32_1 = arith.constant 0 : i32
    return %c0_i32, %c0_i32_0 : i32, i32
  }
  func.func @transform_2(%arg0: i32) -> (i32, i32) {
    %c0_i32 = arith.constant 0 : i32
    %c0_i32_0 = arith.constant 0 : i32
    %c0_i32_1 = arith.constant 0 : i32
    return %c0_i32, %c0_i32_0 : i32, i32
  }
  func.func @transform_3(%arg0: i32) -> (i32, i32) {
    %c0_i32 = arith.constant 0 : i32
    %c0_i32_0 = arith.constant 0 : i32
    %c0_i32_1 = arith.constant 0 : i32
    return %c0_i32, %c0_i32_0 : i32, i32
  }
  func.func @transform_4(%arg0: i32) -> (i32, i32) {
    %c0_i32 = arith.constant 0 : i32
    %c0_i32_0 = arith.constant 0 : i32
    %c0_i32_1 = arith.constant 0 : i32
    return %c0_i32, %c0_i32_0 : i32, i32
  }
  func.func @transform_5(%arg0: i32) -> (i32, i32) {
    %c0_i32 = arith.constant 0 : i32
    %c0_i32_0 = arith.constant 0 : i32
    return %arg0, %c0_i32 : i32, i32
  }
}

</mosaic_0001>

<bundles_post_ra>
// kernel: tpu_custom_call.1
= control target key start
LH: loop header
LB: loop body
LE: loop exit
PB: predicated region body
PF: predicated region fallthrough
CT: control target
= control target key end

     0   :  { %10 = vsyncpa [#allocation3], 0  ;;  %s1467_s0 = inlined_call_operand.vmem [shape: f32[512,34], index: 0, kind: input, shape index: {}]   ;;  %s1468_s1 = inlined_call_operand.vmem [shape: bf16[34,256], index: 1, kind: input, shape index: {}]   ;;  %s1469_s2 = inlined_call_operand.vmem [shape: bf16[1,256], index: 2, kind: input, shape index: {}]   ;;  %s1470_s3 = inlined_call_operand.vmem [shape: bf16[256,128], index: 3, kind: input, shape index: {}]   ;;  %s1471_s4 = inlined_call_operand.vmem [shape: f32[1,128], index: 4, kind: input, shape index: {}]   ;;  %s1472_s5 = inlined_call_operand.hbm [shape: f32[512,128], index: 5, kind: output, shape index: {}]  }
   0x1   :  { %12 = vsyncpa [#allocation3 + $0x1], 0  ;;  %s1191_s18 = smov 0   ;;  %s1193_s19 = smov 0  }
   0x2   :  { %s1195_s20 = smov 0   ;;  %s1197_s21 = smov 0  }
   0x3 LB: > { %s1212_s22 = sadd.s32 4294967295, %s1157_s21   ;;  %s924_s23 = sadd.s32 4294967294, %s1157_s21   ;;  %s1157_s21 = sphi %s1197_s21, %s1478_s21   ;;  %s1153_s20 = sphi %s1195_s20, %s1477_s20   ;;  %s1149_s19 = sphi %s1193_s19, %s1476_s19   ;;  %s1145_s18 = sphi %s1191_s18, %s1475_s18  }
   0x4   : > { %s1216_s24 = sadd.s32 1, %s1157_s21   ;;  %s135_s25 = sadd.s32 1, %s1153_s20 }
   0x5   : > { %s132_s26 = ssub.s32 %s1157_s21, %s1216_s24  ;;  %p145_p0 = scmp.ne.s32.totalorder %s1153_s20, %s1149_s19 }
   0x6   : > { %p133_p1 = scmp.eq.s32.totalorder %s132_s26, 0  ;;  %p146_p2 = scmp.eq.s32.totalorder %s1212_s22, 3 }
   0x7   : > { %p151_p3 = scmp.ne.s32.totalorder %s1149_s19, %s1145_s18  ;;  %p152_p4 = scmp.eq.s32.totalorder %s924_s23, 3 }
   0x8   : > { %s1227_s27 = scalar_select %p133_p1, %s1153_s20, %s135_s25  }
   0x9   : > { %p1229_p5 = por %p146_p2, %p145_p0  ;;  %p1233_p6 = por %p152_p4, %p151_p3 }
   0xa   : > { %p927_p7 = scmp.ge.s32.totalorder %s1157_s21, 1  ;;  %p191_p8 = scmp.lt.s32.totalorder %s1157_s21, 5 }
   0xc   : > { %p192_p9 = pnand %p927_p7, %p191_p8 }
   0xd   : > { %s929_s7 = sshll.u32 (!%p192_p9), %s1212_s22, 4  ;;  %s1052_s26 = sshll.u32 (!%p192_p9), %s1212_s22, 7 }
   0xe   : > { %195 = sbr.rel (%p192_p9) target bundleno = 440 (0x1b8), region = 40  ;;  %p220_p10 = scmp.lt.s32.totalorder (!%p192_p9), %s929_s7, 63 }
   0xf   : > { %s858_s8 = scalar_lea.hbm (!%p192_p9), %s1472_s5, %s1052_s26  ;;  %s1115_s15 = scalar_lea.hbm (!%p192_p9), %s1472_s5, 512 }
  0x10   : > { %s861_s10 = sshll.u32 (!%p192_p9), %s858_s8, 4  ;;  %s862_s10 = int_to_ptr.hbm [resolvable:$true] %s861_s10 }
  0x11   : > { %s1109_s22 = sshra.s32 (!%p192_p9), %s862_s10, 4  ;;  %s1110_s22 = int_to_ptr.hbm [resolvable:$true] %s1109_s22 }
  0x12   : > { %p1116_p0 = scmp.lt.s32.totalorder (!%p192_p9), %s1110_s22, %s1472_s5 }
  0x13   : > { %v255_v0 = vld [vmem:[%s1468_s1 + $0x20] sm:$0x11]  ;;  %vm306_vm0 = vcmask 1040384   ;;  %v941_v3 = vld [vmem:[%s1468_s1 + $0x10] sm:$0xf]  ;;  %s1480_s7 = smov (!%p220_p10, %s929_s7), 63 }
  0x14   : > { %v269_v1 = vunpack.c.l.b16 %v255_v0  ;;  %v270_v2 = vunpack.c.h.b16 %v255_v0  ;;  %v1035_v4 = vld [vmem:[%s1468_s1 + $0x14] sm:$0xf0]  ;;  %v1034_v5 = vld [vmem:[%s1468_s1 + $0x14] sm:$0xf]  ;;  %v943_v8 = vld [vmem:[%s1468_s1 + $0x18] sm:$0xf0] }
  0x15   : > { %v942_v11 = vor.u32 %v1035_v4, %v941_v3  ;;  %v946_v12 = vor.u32 %v1034_v5, %v943_v8  ;;  %v933_v13 = vld [vmem:[%s1468_s1] sm:$0xf]  ;;  %v1033_v14 = vld [vmem:[%s1468_s1 + $0x4] sm:$0xf0]  ;;  %v1032_v15 = vld [vmem:[%s1468_s1 + $0x4] sm:$0xf] }
  0x16   : > { %v275_v6 = vpack.c.b16 %v269_v1, %v269_v1  ;;  %v276_v7 = vpack.c.b16 %v270_v2, %v270_v2  ;;  %v935_v16 = vld [vmem:[%s1468_s1 + $0x8] sm:$0xf0]  ;;  %s930_s9 = sshll.u32 %s1480_s7, 3  ;;  %v934_v17 = vor.u32 %v1033_v14, %v933_v13  ;;  %vm281_vm1 = vcmask 277504   ;;  %v1043_v37 = vld [vmem:[%s1470_s3 + $0x38] sm:$0xff]  ;;  %v1042_v39 = vld [vmem:[%s1470_s3 + $0x30] sm:$0xff] }
  0x17   : > { %s1270_s12 = scalar_lea.vmem %s1467_s0, %s930_s9  ;;  %v938_v18 = vor.u32 %v1032_v15, %v935_v16  ;;  %v1051_v38 = vld [vmem:[%s1470_s3 + $0x78] sm:$0xff]  ;;  %732 = vmatpush.bf16.msra.mxu2 %v1043_v37  ;;  %v1050_v40 = vld [vmem:[%s1470_s3 + $0x70] sm:$0xff]  ;;  %v427_v41 = vld [vmem:[%s1469_s2] sm:$0x3]  ;;  %s1111_s7 = scalar_lea.hbm %s1110_s22, 128 }
  0x18   : > { %v308_v9 = vsel %vm306_vm0, %v275_v6, 0  ;;  %v311_v10 = vsel %vm306_vm0, %v276_v7, 0  ;;  %v227_v19 = vld [vmem:[%s1270_s12] sm:$0xff]  ;;  %v228_v20 = vld [vmem:[%s1270_s12 + $0x8] sm:$0xff]  ;;  %v229_v22 = vld [vmem:[%s1270_s12 + $0x10] sm:$0xff]  ;;  %781 = vmatpush.bf16.msra.mxu3 %v1051_v38  ;;  %p1112_p11 = scmp.ne.s32.totalorder %s1110_s22, %s1111_s7  ;;  %p1117_p1 = scmp.lt.s32.totalorder %s1115_s15, %s1111_s7 }
  0x19   : > { %318 = vmatpush.bf16.msra.mxu0 %v308_v9  ;;  %367 = vmatpush.bf16.msra.mxu1 %v311_v10  ;;  %v243_v21 = vpack.c.bf16 %v228_v20, %v227_v19  ;;  %v230_v23 = vld [vmem:[%s1270_s12 + $0x18] sm:$0xff]  ;;  %v231_v25 = vld [vmem:[%s1270_s12 + $0x20] sm:$0xff]  ;;  %v232_v26 = vld [vmem:[%s1270_s12 + $0x28] sm:$0xff]  ;;  %429 = vst [vmem:[#allocation1] ss:$9 sm:$0xff] %v427_v41 }
  0x1a   : > { %v244_v24 = vpack.c.bf16 %v230_v23, %v229_v22  ;;  %v245_v27 = vpack.c.bf16 %v232_v26, %v231_v25  ;;  %v233_v28 = vld [vmem:[%s1270_s12 + $0x30] sm:$0xff]  ;;  %v234_v29 = vld [vmem:[%s1270_s12 + $0x38] sm:$0xff]  ;;  %v235_v31 = vld [vmem:[%s1270_s12 + $0x40] sm:$0xff]  ;;  %p1113_p12 = pnand %p1112_p11, %p1229_p5  ;;  %p1118_p2 = por %p1117_p1, %p1116_p0 }
  0x1b   : > { %v246_v30 = vpack.c.bf16 %v234_v29, %v233_v28  ;;  %v236_v32 = vld [vmem:[%s1270_s12 + $0x48] sm:$0xff]  ;;  %v237_v34 = vld [vmem:[%s1270_s12 + $0x50] sm:$0xff]  ;;  %v238_v35 = vld [vmem:[%s1270_s12 + $0x58] sm:$0xff]  ;;  %733 = vmatpush.bf16.msra.mxu2 %v1042_v39 }
  0x1c   : > { %v247_v33 = vpack.c.bf16 %v236_v32, %v235_v31  ;;  %v248_v36 = vpack.c.bf16 %v238_v35, %v237_v34  ;;  %782 = vmatpush.bf16.msra.mxu3 %v1050_v40  ;;  %v1041_v42 = vld [vmem:[%s1470_s3 + $0x28] sm:$0xff]  ;;  %v239_v44 = vld [vmem:[%s1270_s12 + $0x60] sm:$0xff]  ;;  %v1039_v49 = vld [vmem:[%s1470_s3 + $0x18] sm:$0xff]  ;;  %p1114_p13 = pneg %p1113_p12 }
  0x1d   : > { %319 = vmatpush.bf16.msra.mxu0 %v942_v11  ;;  %368 = vmatpush.bf16.msra.mxu1 %v946_v12  ;;  %v1049_v43 = vld [vmem:[%s1470_s3 + $0x68] sm:$0xff]  ;;  %v1040_v46 = vld [vmem:[%s1470_s3 + $0x20] sm:$0xff]  ;;  %v1047_v50 = vld [vmem:[%s1470_s3 + $0x58] sm:$0xff] }
  0x1e   : > { %v240_v45 = vld [vmem:[%s1270_s12 + $0x68] sm:$0xff]  ;;  %v1048_v47 = vld [vmem:[%s1470_s3 + $0x60] sm:$0xff]  ;;  %v1038_v51 = vld [vmem:[%s1470_s3 + $0x10] sm:$0xff]  ;;  %p1119_p3 = pnand %p1118_p2, %p1114_p13 }
  0x1f   : > { %734 = vmatpush.bf16.msra.mxu2 %v1041_v42  ;;  %v249_v48 = vpack.c.bf16 %v240_v45, %v239_v44  ;;  %v1046_v52 = vld [vmem:[%s1470_s3 + $0x50] sm:$0xff]  ;;  %v1037_v53 = vld [vmem:[%s1470_s3 + $0x8] sm:$0xff]  ;;  %v242_v56 = vld [vmem:[%s1270_s12 + $0x78] sm:$0xff] }
  0x20   : > { %783 = vmatpush.bf16.msra.mxu3 %v1049_v43  ;;  %v1045_v54 = vld [vmem:[%s1470_s3 + $0x48] sm:$0xff]  ;;  %v241_v55 = vld [vmem:[%s1270_s12 + $0x70] sm:$0xff]  ;;  %v1036_v57 = vld [vmem:[%s1470_s3] sm:$0xff]  ;;  %s216_s12 = sand.u32 1, %s1149_s19  }
  0x21   : > { %320 = vmatpush.bf16.msra.mxu0 %v934_v17  ;;  %369 = vmatpush.bf16.msra.mxu1 %v938_v18  ;;  %v1044_v58 = vld [vmem:[%s1470_s3 + $0x40] sm:$0xff]  ;;  %v250_v59 = vpack.c.bf16 %v242_v56, %v241_v55  ;;  %v431_v61 = vld [vmem:[#allocation1 + $0x9] sm:$0xff]  ;;  %s928_s23 = sshll.u32 %s216_s12, 7  ;;  %s847_s11 = scalar_lea.sflag [#allocation3], %s216_s12 }
  0x22   : > { %v430_v60 = vld [vmem:[#allocation1] sm:$0xff]  ;;  %v435_v63 = vpack.i.b16 %v431_v61, %v431_v61  ;;  %s1400_s25 = scalar_lea.vmem [#allocation2], %s928_s23 }
  0x23   : > { %735 = vmatpush.bf16.msra.mxu2 %v1040_v46  ;;  %v432_v62 = vpack.i.b16 %v430_v60, %v430_v60  ;;  %s859_s9 = sshll.u32 %s1400_s25, 4  ;;  %s860_s9 = int_to_ptr.vmem [resolvable:$true] %s859_s9 }
  0x24   : > { %947 = vmatmul.msk.bf16.vlgmr.msra.gmra.mxu0 %vm281_vm1, %v243_v21  ;;  %955 = vmatmul.msk.bf16.vlgmr.msra.gmra.mxu1 %vm281_vm1, %v243_v21  ;;  %v437_v4 = vperm.slane %v435_v63, 0 }
  0x25   : > { %784 = vmatpush.bf16.msra.mxu3 %v1048_v47  ;;  %v434_v3 = vperm.slane %v432_v62, 0 }
  0x26   : > { %v1357_v8 = vunpack.c.l.bf16 %v437_v4 }
  0x27   : > { %736 = vmatpush.bf16.msra.mxu2 %v1039_v49  ;;  %v1355_v7 = vunpack.c.l.bf16 %v434_v3 }
  0x29   : > { %785 = vmatpush.bf16.msra.mxu3 %v1047_v50 }
  0x2b   : > { %737 = vmatpush.bf16.msra.mxu2 %v1038_v51 }
  0x2d   : > { %786 = vmatpush.bf16.msra.mxu3 %v1046_v52 }
  0x2f   : > { %738 = vmatpush.bf16.msra.mxu2 %v1037_v53 }
  0x31   : > { %787 = vmatpush.bf16.msra.mxu3 %v1045_v54 }
  0x33   : > { %739 = vmatpush.bf16.msra.mxu2 %v1036_v57 }
  0x34   : > { %948 = vmatmul.msk.bf16.gmra.mxu0 %vm281_vm1, %v244_v24  ;;  %956 = vmatmul.msk.bf16.gmra.mxu1 %vm281_vm1, %v244_v24 }
  0x35   : > { %788 = vmatpush.bf16.msra.mxu3 %v1044_v58 }
  0x44   : > { %949 = vmatmul.msk.bf16.gmra.mxu0 %vm281_vm1, %v245_v27  ;;  %957 = vmatmul.msk.bf16.gmra.mxu1 %vm281_vm1, %v245_v27 }
  0x54   : > { %950 = vmatmul.msk.bf16.gmra.mxu0 %vm281_vm1, %v246_v30  ;;  %958 = vmatmul.msk.bf16.gmra.mxu1 %vm281_vm1, %v246_v30 }
  0x64   : > { %951 = vmatmul.msk.bf16.gmra.mxu0 %vm281_vm1, %v247_v33  ;;  %959 = vmatmul.msk.bf16.gmra.mxu1 %vm281_vm1, %v247_v33 }
  0x74   : > { %952 = vmatmul.msk.bf16.gmra.mxu0 %vm281_vm1, %v248_v36  ;;  %960 = vmatmul.msk.bf16.gmra.mxu1 %vm281_vm1, %v248_v36 }
  0x84   : > { %953 = vmatmul.msk.bf16.gmra.mxu0 %vm281_vm1, %v249_v48  ;;  %961 = vmatmul.msk.bf16.gmra.mxu1 %vm281_vm1, %v249_v48 }
  0x94   : > { %954 = vmatmul.msk.bf16.gmra.mxu0 %vm281_vm1, %v250_v59  ;;  %962 = vmatmul.msk.bf16.gmra.mxu1 %vm281_vm1, %v250_v59 }
  0xa1   : > { %v322_v0 = vpop.f32.mrf.mxu0  ;;  %v371_v1 = vpop.f32.mrf.mxu1 }
  0xa2   : > { %v411_v2 = vpack.c.bf16 %v371_v1, %v322_v0 }
  0xa4   : > { %v438_v5 = vunpack.c.l.bf16 %v411_v2  ;;  %v439_v6 = vunpack.c.h.bf16 %v411_v2 }
  0xa6   : > { %v472_v14 = vadd.f32 %v1355_v7, %v438_v5  ;;  %v473_v15 = vadd.f32 %v1357_v8, %v439_v6 }
  0xa8   : > { %v552_v18 = vmax.f32 %v472_v14, 0.0  ;;  %v553_v20 = vmax.f32 %v473_v15, 0.0 }
  0xa9   : > { %v324_v9 = vpop.f32.mrf.mxu0  ;;  %v373_v10 = vpop.f32.mrf.mxu1 }
  0xaa   : > { %v412_v11 = vpack.c.bf16 %v373_v10, %v324_v9 }
  0xac   : > { %v440_v12 = vunpack.c.l.bf16 %v412_v11  ;;  %v441_v13 = vunpack.c.h.bf16 %v412_v11 }
  0xae   : > { %v474_v16 = vadd.f32 %v1355_v7, %v440_v12  ;;  %v475_v17 = vadd.f32 %v1357_v8, %v441_v13 }
  0xb0   : > { %v554_v19 = vmax.f32 %v474_v16, 0.0  ;;  %v555_v21 = vmax.f32 %v475_v17, 0.0 }
  0xb1   : > { %v327_v22 = vpop.f32.mrf.mxu0  ;;  %v376_v23 = vpop.f32.mrf.mxu1 }
  0xb2   : > { %v584_v24 = vpack.c.bf16 %v554_v19, %v552_v18  ;;  %v585_v25 = vpack.c.bf16 %v555_v21, %v553_v20  ;;  %v413_v26 = vpack.c.bf16 %v376_v23, %v327_v22 }
  0xb4   : > { %740 = vmatmul.bf16.vlgmr.msra.gmra.mxu2 %v584_v24  ;;  %789 = vmatmul.bf16.vlgmr.msra.gmra.mxu3 %v585_v25  ;;  %v442_v27 = vunpack.c.l.bf16 %v413_v26  ;;  %v443_v28 = vunpack.c.h.bf16 %v413_v26 }
  0xb6   : > { %v476_v34 = vadd.f32 %v1355_v7, %v442_v27  ;;  %v477_v35 = vadd.f32 %v1357_v8, %v443_v28 }
  0xb8   : > { %v556_v38 = vmax.f32 %v476_v34, 0.0  ;;  %v557_v40 = vmax.f32 %v477_v35, 0.0 }
  0xb9   : > { %v329_v29 = vpop.f32.mrf.mxu0  ;;  %v378_v30 = vpop.f32.mrf.mxu1 }
  0xba   : > { %v414_v31 = vpack.c.bf16 %v378_v30, %v329_v29 }
  0xbc   : > { %v444_v32 = vunpack.c.l.bf16 %v414_v31  ;;  %v445_v33 = vunpack.c.h.bf16 %v414_v31 }
  0xbe   : > { %v478_v36 = vadd.f32 %v1355_v7, %v444_v32  ;;  %v479_v37 = vadd.f32 %v1357_v8, %v445_v33 }
  0xc0   : > { %v558_v39 = vmax.f32 %v478_v36, 0.0  ;;  %v559_v41 = vmax.f32 %v479_v37, 0.0 }
  0xc1   : > { %v332_v42 = vpop.f32.mrf.mxu0  ;;  %v381_v43 = vpop.f32.mrf.mxu1 }
  0xc2   : > { %v586_v44 = vpack.c.bf16 %v558_v39, %v556_v38  ;;  %v587_v45 = vpack.c.bf16 %v559_v41, %v557_v40  ;;  %v415_v46 = vpack.c.bf16 %v381_v43, %v332_v42 }
  0xc4   : > { %745 = vmatmul.bf16.gmra.mxu2 %v586_v44  ;;  %794 = vmatmul.bf16.gmra.mxu3 %v587_v45  ;;  %v446_v47 = vunpack.c.l.bf16 %v415_v46  ;;  %v447_v48 = vunpack.c.h.bf16 %v415_v46 }
  0xc6   : > { %v480_v54 = vadd.f32 %v1355_v7, %v446_v47  ;;  %v481_v55 = vadd.f32 %v1357_v8, %v447_v48 }
  0xc8   : > { %v560_v58 = vmax.f32 %v480_v54, 0.0  ;;  %v561_v60 = vmax.f32 %v481_v55, 0.0 }
  0xc9   : > { %v334_v49 = vpop.f32.mrf.mxu0  ;;  %v383_v50 = vpop.f32.mrf.mxu1 }
  0xca   : > { %v416_v51 = vpack.c.bf16 %v383_v50, %v334_v49 }
  0xcc   : > { %v448_v52 = vunpack.c.l.bf16 %v416_v51  ;;  %v449_v53 = vunpack.c.h.bf16 %v416_v51 }
  0xce   : > { %v482_v56 = vadd.f32 %v1355_v7, %v448_v52  ;;  %v483_v57 = vadd.f32 %v1357_v8, %v449_v53 }
  0xd0   : > { %v562_v59 = vmax.f32 %v482_v56, 0.0  ;;  %v563_v61 = vmax.f32 %v483_v57, 0.0 }
  0xd1   : > { %v337_v62 = vpop.f32.mrf.mxu0  ;;  %v386_v63 = vpop.f32.mrf.mxu1 }
  0xd2   : > { %v588_v0 = vpack.c.bf16 %v562_v59, %v560_v58  ;;  %v589_v1 = vpack.c.bf16 %v563_v61, %v561_v60  ;;  %v417_v2 = vpack.c.bf16 %v386_v63, %v337_v62 }
  0xd4   : > { %750 = vmatmul.bf16.gmra.mxu2 %v588_v0  ;;  %799 = vmatmul.bf16.gmra.mxu3 %v589_v1  ;;  %v450_v3 = vunpack.c.l.bf16 %v417_v2  ;;  %v451_v4 = vunpack.c.h.bf16 %v417_v2 }
  0xd6   : > { %v484_v12 = vadd.f32 %v1355_v7, %v450_v3  ;;  %v485_v13 = vadd.f32 %v1357_v8, %v451_v4 }
  0xd8   : > { %v564_v16 = vmax.f32 %v484_v12, 0.0  ;;  %v565_v18 = vmax.f32 %v485_v13, 0.0 }
  0xd9   : > { %v339_v5 = vpop.f32.mrf.mxu0  ;;  %v388_v6 = vpop.f32.mrf.mxu1 }
  0xda   : > { %v418_v9 = vpack.c.bf16 %v388_v6, %v339_v5 }
  0xdc   : > { %v452_v10 = vunpack.c.l.bf16 %v418_v9  ;;  %v453_v11 = vunpack.c.h.bf16 %v418_v9 }
  0xde   : > { %v486_v14 = vadd.f32 %v1355_v7, %v452_v10  ;;  %v487_v15 = vadd.f32 %v1357_v8, %v453_v11 }
  0xe0   : > { %v566_v17 = vmax.f32 %v486_v14, 0.0  ;;  %v567_v19 = vmax.f32 %v487_v15, 0.0 }
  0xe1   : > { %v342_v20 = vpop.f32.mrf.mxu0  ;;  %v391_v21 = vpop.f32.mrf.mxu1 }
  0xe2   : > { %v590_v22 = vpack.c.bf16 %v566_v17, %v564_v16  ;;  %v591_v23 = vpack.c.bf16 %v567_v19, %v565_v18  ;;  %v419_v24 = vpack.c.bf16 %v391_v21, %v342_v20 }
  0xe4   : > { %755 = vmatmul.bf16.gmra.mxu2 %v590_v22  ;;  %804 = vmatmul.bf16.gmra.mxu3 %v591_v23  ;;  %v454_v25 = vunpack.c.l.bf16 %v419_v24  ;;  %v455_v26 = vunpack.c.h.bf16 %v419_v24 }
  0xe6   : > { %v488_v32 = vadd.f32 %v1355_v7, %v454_v25  ;;  %v489_v33 = vadd.f32 %v1357_v8, %v455_v26 }
  0xe8   : > { %v568_v36 = vmax.f32 %v488_v32, 0.0  ;;  %v569_v38 = vmax.f32 %v489_v33, 0.0 }
  0xe9   : > { %v344_v27 = vpop.f32.mrf.mxu0  ;;  %v393_v28 = vpop.f32.mrf.mxu1 }
  0xea   : > { %v420_v29 = vpack.c.bf16 %v393_v28, %v344_v27 }
  0xec   : > { %v456_v30 = vunpack.c.l.bf16 %v420_v29  ;;  %v457_v31 = vunpack.c.h.bf16 %v420_v29 }
  0xee   : > { %v490_v34 = vadd.f32 %v1355_v7, %v456_v30  ;;  %v491_v35 = vadd.f32 %v1357_v8, %v457_v31 }
  0xf0   : > { %v570_v37 = vmax.f32 %v490_v34, 0.0  ;;  %v571_v39 = vmax.f32 %v491_v35, 0.0 }
  0xf1   : > { %v347_v40 = vpop.f32.mrf.mxu0  ;;  %v396_v41 = vpop.f32.mrf.mxu1 }
  0xf2   : > { %v592_v42 = vpack.c.bf16 %v570_v37, %v568_v36  ;;  %v593_v43 = vpack.c.bf16 %v571_v39, %v569_v38  ;;  %v421_v44 = vpack.c.bf16 %v396_v41, %v347_v40  ;;  %v1395_v40 = vld [vmem:[%s1471_s4] ss:$0 sm:$0xff] }
  0xf4   : > { %760 = vmatmul.bf16.gmra.mxu2 %v592_v42  ;;  %809 = vmatmul.bf16.gmra.mxu3 %v593_v43  ;;  %v458_v45 = vunpack.c.l.bf16 %v421_v44  ;;  %v459_v46 = vunpack.c.h.bf16 %v421_v44 }
  0xf6   : > { %v492_v52 = vadd.f32 %v1355_v7, %v458_v45  ;;  %v493_v53 = vadd.f32 %v1357_v8, %v459_v46 }
  0xf8   : > { %v572_v56 = vmax.f32 %v492_v52, 0.0  ;;  %v573_v58 = vmax.f32 %v493_v53, 0.0 }
  0xf9   : > { %v349_v47 = vpop.f32.mrf.mxu0  ;;  %v398_v48 = vpop.f32.mrf.mxu1 }
  0xfa   : > { %v422_v49 = vpack.c.bf16 %v398_v48, %v349_v47 }
  0xfc   : > { %v460_v50 = vunpack.c.l.bf16 %v422_v49  ;;  %v461_v51 = vunpack.c.h.bf16 %v422_v49 }
  0xfe   : > { %v494_v54 = vadd.f32 %v1355_v7, %v460_v50  ;;  %v495_v55 = vadd.f32 %v1357_v8, %v461_v51 }
 0x100   : > { %v574_v57 = vmax.f32 %v494_v54, 0.0  ;;  %v575_v59 = vmax.f32 %v495_v55, 0.0 }
 0x101   : > { %v352_v60 = vpop.f32.mrf.mxu0  ;;  %v401_v61 = vpop.f32.mrf.mxu1 }
 0x102   : > { %v594_v62 = vpack.c.bf16 %v574_v57, %v572_v56  ;;  %v595_v63 = vpack.c.bf16 %v575_v59, %v573_v58  ;;  %v423_v0 = vpack.c.bf16 %v401_v61, %v352_v60 }
 0x104   : > { %765 = vmatmul.bf16.gmra.mxu2 %v594_v62  ;;  %814 = vmatmul.bf16.gmra.mxu3 %v595_v63  ;;  %v462_v1 = vunpack.c.l.bf16 %v423_v0  ;;  %v463_v2 = vunpack.c.h.bf16 %v423_v0 }
 0x106   : > { %v496_v10 = vadd.f32 %v1355_v7, %v462_v1  ;;  %v497_v11 = vadd.f32 %v1357_v8, %v463_v2 }
 0x108   : > { %v576_v14 = vmax.f32 %v496_v10, 0.0  ;;  %v577_v16 = vmax.f32 %v497_v11, 0.0 }
 0x109   : > { %v354_v3 = vpop.f32.mrf.mxu0  ;;  %v403_v4 = vpop.f32.mrf.mxu1 }
 0x10a   : > { %v424_v5 = vpack.c.bf16 %v403_v4, %v354_v3 }
 0x10c   : > { %v464_v6 = vunpack.c.l.bf16 %v424_v5  ;;  %v465_v9 = vunpack.c.h.bf16 %v424_v5 }
 0x10e   : > { %v498_v12 = vadd.f32 %v1355_v7, %v464_v6  ;;  %v499_v13 = vadd.f32 %v1357_v8, %v465_v9 }
 0x110   : > { %v578_v15 = vmax.f32 %v498_v12, 0.0  ;;  %v579_v17 = vmax.f32 %v499_v13, 0.0 }
 0x111   : > { %v357_v18 = vpop.f32.mrf.mxu0  ;;  %v406_v19 = vpop.f32.mrf.mxu1 }
 0x112   : > { %v596_v20 = vpack.c.bf16 %v578_v15, %v576_v14  ;;  %v597_v21 = vpack.c.bf16 %v579_v17, %v577_v16  ;;  %v425_v22 = vpack.c.bf16 %v406_v19, %v357_v18 }
 0x114   : > { %770 = vmatmul.bf16.gmra.mxu2 %v596_v20  ;;  %819 = vmatmul.bf16.gmra.mxu3 %v597_v21  ;;  %v466_v23 = vunpack.c.l.bf16 %v425_v22  ;;  %v467_v24 = vunpack.c.h.bf16 %v425_v22 }
 0x116   : > { %v500_v30 = vadd.f32 %v1355_v7, %v466_v23  ;;  %v501_v31 = vadd.f32 %v1357_v8, %v467_v24 }
 0x118   : > { %v580_v34 = vmax.f32 %v500_v30, 0.0  ;;  %v581_v36 = vmax.f32 %v501_v31, 0.0 }
 0x119   : > { %v359_v25 = vpop.f32.mrf.mxu0  ;;  %v408_v26 = vpop.f32.mrf.mxu1 }
 0x11a   : > { %v426_v27 = vpack.c.bf16 %v408_v26, %v359_v25 }
 0x11c   : > { %v468_v28 = vunpack.c.l.bf16 %v426_v27  ;;  %v469_v29 = vunpack.c.h.bf16 %v426_v27 }
 0x11e   : > { %v502_v32 = vadd.f32 %v1355_v7, %v468_v28  ;;  %v503_v33 = vadd.f32 %v1357_v8, %v469_v29 }
 0x120   : > { %v582_v35 = vmax.f32 %v502_v32, 0.0  ;;  %v583_v37 = vmax.f32 %v503_v33, 0.0 }
 0x122   : > { %v598_v38 = vpack.c.bf16 %v582_v35, %v580_v34  ;;  %v599_v39 = vpack.c.bf16 %v583_v37, %v581_v36 }
 0x124   : > { %775 = vmatmul.bf16.gmra.mxu2 %v598_v38  ;;  %824 = vmatmul.bf16.gmra.mxu3 %v599_v39 }
 0x137   : > { %v741_v41 = vpop.f32.mrf.mxu2  ;;  %v790_v7 = vpop.f32.mrf.mxu3 }
 0x138   : > { %v742_v8 = vadd.f32 %v1395_v40, %v741_v41 }
 0x13a   : > { %v791_v42 = vadd.f32 %v790_v7, %v742_v8 }
 0x13c   : > { %830 = vst [vmem:[%s1400_s25] sm:$0xff] %v791_v42 }
 0x13f   : > { %v743_v43 = vpop.f32.mrf.mxu2  ;;  %v792_v44 = vpop.f32.mrf.mxu3 }
 0x140   : > { %v744_v45 = vadd.f32 %v1395_v40, %v743_v43 }
 0x142   : > { %v793_v46 = vadd.f32 %v792_v44, %v744_v45 }
 0x144   : > { %831 = vst [vmem:[%s1400_s25 + $0x8] sm:$0xff] %v793_v46 }
 0x147   : > { %v746_v47 = vpop.f32.mrf.mxu2  ;;  %v795_v48 = vpop.f32.mrf.mxu3 }
 0x148   : > { %v747_v49 = vadd.f32 %v1395_v40, %v746_v47 }
 0x14a   : > { %v796_v50 = vadd.f32 %v795_v48, %v747_v49 }
 0x14c   : > { %832 = vst [vmem:[%s1400_s25 + $0x10] sm:$0xff] %v796_v50 }
 0x14f   : > { %v748_v51 = vpop.f32.mrf.mxu2  ;;  %v797_v52 = vpop.f32.mrf.mxu3 }
 0x150   : > { %v749_v53 = vadd.f32 %v1395_v40, %v748_v51 }
 0x152   : > { %v798_v54 = vadd.f32 %v797_v52, %v749_v53 }
 0x154   : > { %833 = vst [vmem:[%s1400_s25 + $0x18] sm:$0xff] %v798_v54 }
 0x157   : > { %v751_v55 = vpop.f32.mrf.mxu2  ;;  %v800_v56 = vpop.f32.mrf.mxu3 }
 0x158   : > { %v752_v57 = vadd.f32 %v1395_v40, %v751_v55 }
 0x15a   : > { %v801_v58 = vadd.f32 %v800_v56, %v752_v57 }
 0x15c   : > { %834 = vst [vmem:[%s1400_s25 + $0x20] sm:$0xff] %v801_v58 }
 0x15f   : > { %v753_v59 = vpop.f32.mrf.mxu2  ;;  %v802_v60 = vpop.f32.mrf.mxu3 }
 0x160   : > { %v754_v61 = vadd.f32 %v1395_v40, %v753_v59 }
 0x162   : > { %v803_v62 = vadd.f32 %v802_v60, %v754_v61 }
 0x164   : > { %835 = vst [vmem:[%s1400_s25 + $0x28] sm:$0xff] %v803_v62 }
 0x167   : > { %v756_v63 = vpop.f32.mrf.mxu2  ;;  %v805_v0 = vpop.f32.mrf.mxu3 }
 0x168   : > { %v757_v1 = vadd.f32 %v1395_v40, %v756_v63 }
 0x16a   : > { %v806_v2 = vadd.f32 %v805_v0, %v757_v1 }
 0x16c   : > { %836 = vst [vmem:[%s1400_s25 + $0x30] sm:$0xff] %v806_v2 }
 0x16f   : > { %v758_v3 = vpop.f32.mrf.mxu2  ;;  %v807_v4 = vpop.f32.mrf.mxu3 }
 0x170   : > { %v759_v5 = vadd.f32 %v1395_v40, %v758_v3 }
 0x172   : > { %v808_v6 = vadd.f32 %v807_v4, %v759_v5 }
 0x174   : > { %837 = vst [vmem:[%s1400_s25 + $0x38] sm:$0xff] %v808_v6 }
 0x177   : > { %v761_v9 = vpop.f32.mrf.mxu2  ;;  %v810_v10 = vpop.f32.mrf.mxu3 }
 0x178   : > { %v762_v11 = vadd.f32 %v1395_v40, %v761_v9 }
 0x17a   : > { %v811_v12 = vadd.f32 %v810_v10, %v762_v11 }
 0x17c   : > { %838 = vst [vmem:[%s1400_s25 + $0x40] sm:$0xff] %v811_v12 }
 0x17f   : > { %v763_v13 = vpop.f32.mrf.mxu2  ;;  %v812_v14 = vpop.f32.mrf.mxu3 }
 0x180   : > { %v764_v15 = vadd.f32 %v1395_v40, %v763_v13 }
 0x182   : > { %v813_v16 = vadd.f32 %v812_v14, %v764_v15 }
 0x184   : > { %839 = vst [vmem:[%s1400_s25 + $0x48] sm:$0xff] %v813_v16 }
 0x187   : > { %v766_v17 = vpop.f32.mrf.mxu2  ;;  %v815_v18 = vpop.f32.mrf.mxu3 }
 0x188   : > { %v767_v19 = vadd.f32 %v1395_v40, %v766_v17 }
 0x18a   : > { %v816_v20 = vadd.f32 %v815_v18, %v767_v19 }
 0x18c   : > { %840 = vst [vmem:[%s1400_s25 + $0x50] sm:$0xff] %v816_v20 }
 0x18f   : > { %v768_v21 = vpop.f32.mrf.mxu2  ;;  %v817_v22 = vpop.f32.mrf.mxu3 }
 0x190   : > { %v769_v23 = vadd.f32 %v1395_v40, %v768_v21 }
 0x192   : > { %v818_v24 = vadd.f32 %v817_v22, %v769_v23 }
 0x194   : > { %841 = vst [vmem:[%s1400_s25 + $0x58] sm:$0xff] %v818_v24 }
 0x197   : > { %v771_v25 = vpop.f32.mrf.mxu2  ;;  %v820_v26 = vpop.f32.mrf.mxu3 }
 0x198   : > { %v772_v27 = vadd.f32 %v1395_v40, %v771_v25 }
 0x19a   : > { %v821_v28 = vadd.f32 %v820_v26, %v772_v27 }
 0x19c   : > { %842 = vst [vmem:[%s1400_s25 + $0x60] sm:$0xff] %v821_v28 }
 0x19f   : > { %v773_v29 = vpop.f32.mrf.mxu2  ;;  %v822_v30 = vpop.f32.mrf.mxu3 }
 0x1a0   : > { %v774_v31 = vadd.f32 %v1395_v40, %v773_v29 }
 0x1a2   : > { %v823_v32 = vadd.f32 %v822_v30, %v774_v31 }
 0x1a4   : > { %843 = vst [vmem:[%s1400_s25 + $0x68] sm:$0xff] %v823_v32 }
 0x1a7   : > { %v776_v33 = vpop.f32.mrf.mxu2  ;;  %v825_v34 = vpop.f32.mrf.mxu3 }
 0x1a8   : > { %v777_v35 = vadd.f32 %v1395_v40, %v776_v33 }
 0x1aa   : > { %v826_v36 = vadd.f32 %v825_v34, %v777_v35 }
 0x1ac   : > { %844 = vst [vmem:[%s1400_s25 + $0x70] sm:$0xff] %v826_v36 }
 0x1af   : > { %v778_v37 = vpop.f32.mrf.mxu2  ;;  %v827_v39 = vpop.f32.mrf.mxu3 }
 0x1b0   : > { %v779_v38 = vadd.f32 %v1395_v40, %v778_v37 }
 0x1b2   : > { %v828_v41 = vadd.f32 %v827_v39, %v779_v38 }
 0x1b4   : > { %845 = vst [vmem:[%s1400_s25 + $0x78] sm:$0xff] %v828_v41 }
 0x1b5   : > { %1122 = shalt.err (!%p1119_p3)
}
 0x1b6   : > { %s1159_s12 = smov 128   ;;  %s1160_s23 = smov 8  }
 0x1b7   : > { %1053 = dma.vmem_to_hbm [thread:$0]  (%p1229_p5), %s860_s9, 2048, %s862_s10, %s847_s11, %s1159_s12, %s1159_s12, %s1160_s23  }
 0x1b8 PF: > { %p1059_p4 = scmp.ge.s32.totalorder %s1157_s21, 2  ;;  %s876_s25 = sand.u32 1, %s1145_s18  }
 0x1b9   : > { %s877_s26 = scalar_lea.sflag [#allocation3], %s876_s25 }
 0x1ba   : > { %p1056_p7 = pnand %p1059_p4, %p1233_p6 }
 0x1bc   : > { %p1057_p8 = pneg %p1056_p7 }
 0x1be   : > { %1140 = dma.done.wait (%p1057_p8), %s877_s26, 2048  }
 0x1bf   : > { %1142 = vsyncadd (%p1057_p8), %s877_s26, 4294965248  ;;  %p15_p9 = scmp.ge.s32.totalorder %s1216_s24, 6   ;;  %s1475_s18 = smov %s1149_s19 }
 0x1c0   : > { %s1476_s19 = smov %s1153_s20  ;;  %s1477_s20 = smov %s1227_s27 }
 0x1c1   : > { %s1478_s21 = smov %s1216_s24  ;;  %17 = sbr.rel (!%p15_p9) target bundleno = 3 (0x3), region = 75 }
 0x1c6   :  { %883 = vsyncpa [#allocation3], 1 }
 0x1c7   :  { %885 = vsyncpa [#allocation3 + $0x1], 1 }

</bundles_post_ra>
